<compile_context>
chip_gen: v5e
topology: v5e:2x2
jax: 0.10.0
libtpu: 0.0.40
codegen_flags: <defaults>
</compile_context>

<pallas_src>
import jax
import jax.numpy as jnp
from jax.experimental import pallas as pl
from jax.experimental.pallas import tpu as pltpu


def build_positional_encoding(d_model, max_len=5000, hpar=10000.0):
    """Builds the pe buffer exactly like the torch __init__ (shape (maxLen, D))."""
    assert d_model % 2 == 0, "PositionalEncoding requires an even dModel"
    half = d_model // 2
    position = jnp.arange(max_len, dtype=jnp.float32)[:, None]            # (maxLen, 1)
    div_term = hpar ** (2.0 * jnp.arange(half, dtype=jnp.float32) / d_model)  # (half,)
    angles = position / div_term[None, :]                                 # (maxLen, half)
    pe = jnp.zeros((max_len, d_model), dtype=jnp.float32)
    pe = pe.at[:, 0::2].set(jnp.sin(angles))
    pe = pe.at[:, 1::2].set(jnp.cos(angles))
    return pe


def _pe_forward_kernel(pe_ref, o_ref):
    # pe_ref: (tl, D) tile of the positional-encoding table.
    # o_ref : (1, tl, D) output tile for one batch row -> single lane-dense store.
    o_ref[...] = pe_ref[...][None, :, :]


def positional_encoding_forward(x, pe, *, tl=None):
    """x: (B, L) (values unused, matches torch.zeros_like(x)); pe: (maxLen, D).

    Returns (B, L, D) float32 = pe[:L] broadcast over the batch dimension.
    """
    B, L = x.shape
    max_len, D = pe.shape
    assert L <= max_len

    # Bounded L tile (perf feedback: never size blocks to the full problem).
    # Cap each block at ~2 MiB so 2x double-buffered in + out blocks stay far
    # below the scoped VMEM limit on every TPU generation.
    if tl is None:
        bytes_per_row = D * 4
        max_rows = max(8, (2 * 1024 * 1024) // bytes_per_row)
        max_rows = max(8, (max_rows // 8) * 8)  # sublane (8) alignment
        tl = min(L, max_rows)
    if tl < L:
        # When actually tiling L, the block dim must satisfy the (8,128) rule.
        tl = max(8, (tl // 8) * 8)

    # Slice the buffer to the used positions (cheap leading-dim slice) so that
    # the tl == L case satisfies the "block equals full dim" BlockSpec rule.
    pe_used = pe[:L]

    grid = (B, pl.cdiv(L, tl))

    out = pl.pallas_call(
        _pe_forward_kernel,
        out_shape=jax.ShapeDtypeStruct((B, L, D), jnp.float32),
        grid_spec=pltpu.PrefetchScalarGridSpec(
            num_scalar_prefetch=0,
            grid=grid,
            in_specs=[pl.BlockSpec((tl, D), lambda b, l: (l, 0))],
            out_specs=pl.BlockSpec((1, tl, D), lambda b, l: (b, l, 0)),
        ),
        compiler_params=pltpu.CompilerParams(
            dimension_semantics=("parallel", "parallel"),
        ),
        cost_estimate=pl.CostEstimate(
            flops=0,
            transcendentals=0,
            bytes_accessed=B * L * D * 4 + L * D * 4,
        ),
    )(pe_used)
    return out


if __name__ == "__main__":
    # Small deterministic shapes consistent with the module: x is (B, Len) of
    # token-like values, dModel is the embedding size.
    B, L, D, MAX_LEN = 2, 8, 32, 64

    key = jax.random.PRNGKey(0)
    x = jax.random.randint(key, (B, L), 0, 100, dtype=jnp.int32)  # values unused

    pe = build_positional_encoding(D, max_len=MAX_LEN)  # module __init__ buffer

    out = positional_encoding_forward(x, pe)
    out = jax.block_until_ready(out)

    # Reference: torch forward == pe[:L] broadcast over batch, float32.
    ref = jnp.broadcast_to(pe[:L][None, :, :], (B, L, D)).astype(jnp.float32)
    assert out.shape == (B, L, D)
    assert out.dtype == jnp.float32
    assert jnp.array_equal(out, ref)

    print("KERNEL_OK")
</pallas_src>

<mosaic_0001>
module attributes {stable_mosaic.version = 11 : i64} {
  func.func @_pe_forward_kernel(%arg0: i32, %arg1: i32, %arg2: memref<8x32xf32, #tpu.memory_space<vmem>>, %arg3: memref<1x8x32xf32, #tpu.memory_space<vmem>>) attributes {dimension_semantics = [#tpu.dimension_semantics<parallel>, #tpu.dimension_semantics<parallel>], iteration_bounds = array<i64: 2, 1>, scalar_prefetch = 0 : i64, scratch_operands = 0 : i64, tpu.core_type = #tpu.core_type<tc>, window_params = [{transform_indices = @transform_0, window_bounds = array<i64: 8, 32>}, {transform_indices = @transform_1, window_bounds = array<i64: 1, 8, 32>}]} {
    %c0 = arith.constant 0 : index
    %c0_0 = arith.constant 0 : index
    %0 = vector.load %arg2[%c0, %c0_0] : memref<8x32xf32, #tpu.memory_space<vmem>>, vector<8x32xf32>
    %1 = vector.shape_cast %0 : vector<8x32xf32> to vector<1x8x32xf32>
    %c0_1 = arith.constant 0 : index
    %c0_2 = arith.constant 0 : index
    %c0_3 = arith.constant 0 : index
    %2 = vector.load %arg3[%c0_1, %c0_2, %c0_3] : memref<1x8x32xf32, #tpu.memory_space<vmem>>, vector<1x8x32xf32>
    tpu.vector_store %arg3[%c0_1, %c0_2, %c0_3], %1 {strides = array<i32>} : memref<1x8x32xf32, #tpu.memory_space<vmem>>, vector<1x8x32xf32>,
    return
  }
  func.func @transform_0(%arg0: i32, %arg1: i32) -> (i32, i32) {
    %c0_i32 = arith.constant 0 : i32
    %c0_i32_0 = arith.constant 0 : i32
    return %arg1, %c0_i32 : i32, i32
  }
  func.func @transform_1(%arg0: i32, %arg1: i32) -> (i32, i32, i32) {
    %c0_i32 = arith.constant 0 : i32
    %c0_i32_0 = arith.constant 0 : i32
    return %arg0, %arg1, %c0_i32 : i32, i32, i32
  }
}

</mosaic_0001>

<bundles_post_ra>
// kernel: tpu_custom_call.1
= control target key start
LH: loop header
LB: loop body
LE: loop exit
PB: predicated region body
PF: predicated region fallthrough
CT: control target
= control target key end

     0   :  { %6 = vsyncpa [#allocation3], 0  ;;  %s518_s0 = inlined_call_operand.hbm [shape: f32[8,32], index: 0, kind: input, shape index: {}]   ;;  %s519_s1 = inlined_call_operand.hbm [shape: f32[2,8,32], index: 1, kind: output, shape index: {}]  }
   0x1   :  { %7 = vsyncpa [#allocation4], 0 }
   0x2   :  { %9 = vsyncpa [#allocation4 + $0x1], 0  ;;  %s423_s6 = smov 0   ;;  %s425_s7 = smov 0  }
   0x3   :  { %s427_s8 = smov 0   ;;  %s429_s9 = smov 0  }
   0x4   :  { %s431_s10 = smov 0   ;;  %s433_s11 = smov 0  }
   0x5 LB: > { %s221_s12 = sadd.s32 4294967295, %s410_s11   ;;  %s222_s13 = sadd.s32 4294967294, %s410_s11   ;;  %s410_s11 = sphi %s433_s11, %s15_s11   ;;  %s406_s10 = sphi %s431_s10, %s526_s10   ;;  %s402_s9 = sphi %s429_s9, %s525_s9   ;;  %s398_s8 = sphi %s427_s8, %s524_s8   ;;  %s394_s7 = sphi %s425_s7, %s523_s7   ;;  %s390_s6 = sphi %s423_s6, %s522_s6  }
   0x6   : > { %s27_s14 = sadd.s32 1, %s406_s10  ;;  %s62_s15 = sadd.s32 1, %s398_s8 }
   0x7   : > { %p29_p0 = scmp.ge.s32.totalorder %s27_s14, 2  ;;  %p72_p1 = scmp.ne.s32.totalorder %s398_s8, %s394_s7 }
   0x8   : > { %p73_p2 = scmp.eq.s32.totalorder %s221_s12, 1  ;;  %p78_p3 = scmp.ne.s32.totalorder %s394_s7, %s390_s6 }
   0x9   : > { %s528_s14 = smov (%p29_p0, %s27_s14), 0  ;;  %p79_p5 = scmp.eq.s32.totalorder %s222_s13, 1 }
   0xa   : > { %p463_p4 = por %p73_p2, %p72_p1  ;;  %s57_s17 = ssub.s32 %s406_s10, %s528_s14 }
   0xb   : > { %p223_p6 = scmp.ge.s32.totalorder %s410_s11, 1  ;;  %p60_p7 = scmp.eq.s32.totalorder %s57_s17, 0 }
   0xc   : > { %p470_p8 = por %p79_p5, %p78_p3  ;;  %p86_p9 = scmp.lt.s32.totalorder %s410_s11, 3 }
   0xd   : > { %s476_s19 = scalar_select %p60_p7, %s398_s8, %s62_s15  }
   0xe   : > { %p87_p10 = pnand %p223_p6, %p86_p9  ;;  %p246_p11 = scmp.eq.s32.totalorder %s221_s12, 0 }
   0xf   : > { %s100_s22 = sshll.u32 %s518_s0, 4  ;;  %s412_s23 = smov [#allocation2]   ;;  %s101_s22 = int_to_ptr.hbm [resolvable:$true] %s100_s22 }
  0x10   : > { %p238_p12 = pneg %p87_p10  ;;  %s102_s24 = sshll.u32 %s412_s23, 4  ;;  %s103_s24 = int_to_ptr.vmem [resolvable:$true] %s102_s24 }
  0x11   : > { %115 = sbr.rel (%p87_p10) target bundleno = 39 (0x27), region = 24 }
  0x12   : > { %p239_p13 = pnand %p246_p11, %p238_p12 }
  0x14   : > { %241 = dma.hbm_to_vmem [thread:$0]  (!%p239_p13), %s101_s22, 128, %s103_s24, [#allocation3]  }
  0x16   : > { %381 = dma.done.wait (%p246_p11), [#allocation3], 128  }
  0x17   : > { %383 = vsyncadd (%p246_p11), [#allocation3], 4294967168  ;;  %s128_s25 = sand.u32 1, %s394_s7   ;;  %s229_s26 = sshll.u32 %s402_s9, 3  ;;  %vm132_vm0 = vcmask 261120   ;;  %v131_v0 = vld [vmem:[#allocation2] sm:$0xff] }
  0x18   : > { %s227_s27 = sshll.u32 %s128_s25, 3  ;;  %s146_s30 = scalar_lea.hbm %s519_s1, %s229_s26 }
  0x19   : > { %s130_s2 = scalar_lea.vmem [#allocation5], %s227_s27  ;;  %s150_s4 = sshll.u32 %s146_s30, 4  ;;  %s151_s4 = int_to_ptr.hbm [resolvable:$true] %s150_s4 }
  0x1a   : > { %s148_s3 = sshll.u32 %s130_s2, 4  ;;  %133 = vst.msk [vmem:[%s130_s2] sm:$0xff] %vm132_vm0, %v131_v0  ;;  %s135_s5 = scalar_lea.sflag [#allocation4], %s128_s25  ;;  %s149_s3 = int_to_ptr.vmem [resolvable:$true] %s148_s3 }
  0x1b   : > { %s342_s12 = sshra.s32 %s151_s4, 4  ;;  %s348_s17 = scalar_lea.hbm %s519_s1, 16  ;;  %s343_s12 = int_to_ptr.hbm [resolvable:$true] %s342_s12 }
  0x1c   : > { %s344_s13 = scalar_lea.hbm %s343_s12, 8  ;;  %p349_p3 = scmp.lt.s32.totalorder %s343_s12, %s519_s1 }
  0x1d   : > { %p345_p0 = scmp.ne.s32.totalorder %s343_s12, %s344_s13  ;;  %p350_p5 = scmp.lt.s32.totalorder %s348_s17, %s344_s13 }
  0x1f   : > { %p346_p1 = pnand %p345_p0, %p463_p4  ;;  %p351_p6 = por %p350_p5, %p349_p3 }
  0x21   : > { %p347_p2 = pneg %p346_p1 }
  0x23   : > { %p352_p7 = pnand %p351_p6, %p347_p2 }
  0x25   : > { %355 = shalt.err (!%p352_p7)
}
  0x26   : > { %236 = dma.vmem_to_hbm [thread:$0]  (%p463_p4), %s149_s3, 128, %s151_s4, %s135_s5  }
  0x27 PF: > { %p248_p9 = scmp.ge.s32.totalorder %s410_s11, 2  ;;  %s162_s22 = sand.u32 1, %s390_s6  }
  0x28   : > { %s163_s23 = scalar_lea.sflag [#allocation4], %s162_s22 }
  0x29   : > { %p243_p10 = pnand %p248_p9, %p470_p8 }
  0x2b   : > { %p244_p11 = pneg %p243_p10 }
  0x2d   : > { %385 = dma.done.wait (%p244_p11), %s163_s23, 128  }
  0x2e   : > { %387 = vsyncadd (%p244_p11), %s163_s23, 4294967168  ;;  %s15_s11 = sadd.s32 1, %s410_s11   ;;  %s522_s6 = smov %s394_s7 }
  0x2f   : > { %p12_p12 = scmp.ge.s32.totalorder %s15_s11, 4   ;;  %s523_s7 = smov %s398_s8 }
  0x30   : > { %s524_s8 = smov %s476_s19  ;;  %s525_s9 = smov %s406_s10 }
  0x31   : > { %s526_s10 = smov %s528_s14  ;;  %14 = sbr.rel (!%p12_p12) target bundleno = 5 (0x5), region = 62 }
  0x36   :  { %169 = vsyncpa [#allocation3], 1 }
  0x37   :  { %171 = vsyncpa [#allocation3 + $0x1], 1 }
  0x38   :  { %172 = vsyncpa [#allocation4], 1 }
  0x39   :  { %174 = vsyncpa [#allocation4 + $0x1], 1 }

</bundles_post_ra>
